<compile_context>
chip_gen: v7x
topology: tpu7x:2x2x1
jax: 0.10.0
libtpu: 0.0.40
codegen_flags: <defaults>
</compile_context>

<pallas_src>
import functools

import jax
import jax.numpy as jnp
from jax import lax
from jax.experimental import pallas as pl
from jax.experimental.pallas import tpu as pltpu

# ~2 MiB per f32 input block (512K elements); double-buffered 2 inputs (+ output
# for 'none') stays well inside the 32 MiB scoped-VMEM budget on v5e/v6e/v7x.
_TARGET_BLOCK_ELEMS = 512 * 1024
_VMEM_LIMIT_BYTES = 32 * 1024 * 1024


def _choose_layout(n, target_block_elems):
    """Pick (lanes, rows, block_rows, pad) so the flat array reshapes for free.

    Prefers a lane width that divides n exactly (no padding copy). Falls back
    to padding to a multiple of 128 only when unavoidable.
    """
    pad = 0
    for lanes in (512, 256, 128):
        if n % lanes == 0:
            rows = n // lanes
            break
    else:
        # TODO(synk): rare fallback (n not a multiple of 128) pays one pad copy.
        lanes = 128
        rows = pl.cdiv(n, lanes)
        pad = rows * lanes - n

    cand = max(1, target_block_elems // lanes)
    cand = max(8, (cand // 8) * 8)          # sublane tile multiple of 8
    block_rows = min(rows, cand)            # block_rows == rows (full dim) is ok
    return lanes, rows, block_rows, pad


def _l1_elementwise_kernel(a_ref, b_ref, o_ref):
    """|a - b| elementwise (reduction='none'), computed in the native dtype."""
    o_ref[...] = jnp.abs(a_ref[...] - b_ref[...]).astype(o_ref.dtype)


def _l1_reduce_kernel(a_ref, b_ref, o_ref, acc_ref, *, rows, block_rows,
                      needs_mask):
    """Accumulate |a - b| into a VMEM f32 vector accumulator; reduce once."""
    i = pl.program_id(0)

    @pl.when(i == 0)
    def _():
        acc_ref[...] = jnp.zeros_like(acc_ref)

    diff = jnp.abs(a_ref[...] - b_ref[...]).astype(jnp.float32)
    if needs_mask:
        # Last block is partial: rows beyond `rows` hold unspecified data.
        row_ids = i * block_rows + lax.broadcasted_iota(jnp.int32, diff.shape, 0)
        diff = jnp.where(row_ids < rows, diff, 0.0)
    acc_ref[...] += diff

    @pl.when(i == pl.num_programs(0) - 1)
    def _():
        o_ref[0, 0] = jnp.sum(acc_ref[...])


def l1_loss_pallas(recon_result, target, reduction="mean",
                   target_block_elems=_TARGET_BLOCK_ELEMS):
    """Pallas TPU implementation of F.l1_loss(recon_result, target, reduction)."""
    assert recon_result.shape == target.shape, "shapes must match (no broadcasting)"
    if reduction not in ("none", "mean", "sum"):
        raise ValueError(f"unknown reduction: {reduction}")

    out_dtype = jnp.result_type(recon_result.dtype, target.dtype)
    n = recon_result.size
    a_bytes = jnp.dtype(recon_result.dtype).itemsize
    b_bytes = jnp.dtype(target.dtype).itemsize
    o_bytes = jnp.dtype(out_dtype).itemsize

    lanes, rows, block_rows, pad = _choose_layout(n, target_block_elems)

    a_flat = recon_result.reshape(-1)
    b_flat = target.reshape(-1)
    if pad:
        a_flat = jnp.pad(a_flat, (0, pad))
        b_flat = jnp.pad(b_flat, (0, pad))
    a2 = a_flat.reshape(rows, lanes)   # row-major reshape: free (bitcast)
    b2 = b_flat.reshape(rows, lanes)

    grid = (pl.cdiv(rows, block_rows),)
    in_specs = [
        pl.BlockSpec((block_rows, lanes), lambda i: (i, 0)),
        pl.BlockSpec((block_rows, lanes), lambda i: (i, 0)),
    ]

    if reduction == "none":
        out2 = pl.pallas_call(
            _l1_elementwise_kernel,
            out_shape=jax.ShapeDtypeStruct((rows, lanes), out_dtype),
            grid_spec=pltpu.PrefetchScalarGridSpec(
                num_scalar_prefetch=0,
                grid=grid,
                in_specs=in_specs,
                out_specs=pl.BlockSpec((block_rows, lanes), lambda i: (i, 0)),
            ),
            compiler_params=pltpu.CompilerParams(
                dimension_semantics=("parallel",),
                vmem_limit_bytes=_VMEM_LIMIT_BYTES,
            ),
            cost_estimate=pl.CostEstimate(
                flops=2 * n,
                transcendentals=0,
                bytes_accessed=n * (a_bytes + b_bytes + o_bytes),
            ),
        )(a2, b2)
        out_flat = out2.reshape(-1)
        if pad:
            out_flat = out_flat[:n]
        return out_flat.reshape(recon_result.shape)

    # 'mean' or 'sum' — reduce to a scalar.
    # TODO(synk): on v7x, split the reduce grid across the 2 TensorCores
    # (per-core partial sums + tiny combine) to reach full chip HBM bandwidth.
    needs_mask = (rows % block_rows) != 0
    kernel = functools.partial(
        _l1_reduce_kernel,
        rows=rows,
        block_rows=block_rows,
        needs_mask=needs_mask,
    )
    total = pl.pallas_call(
        kernel,
        out_shape=jax.ShapeDtypeStruct((1, 1), jnp.float32),
        grid_spec=pltpu.PrefetchScalarGridSpec(
            num_scalar_prefetch=0,
            grid=grid,
            in_specs=in_specs,
            out_specs=pl.BlockSpec((1, 1), lambda i: (0, 0),
                                   memory_space=pltpu.SMEM),
            scratch_shapes=[pltpu.VMEM((block_rows, lanes), jnp.float32)],
        ),
        compiler_params=pltpu.CompilerParams(
            dimension_semantics=("arbitrary",),
            vmem_limit_bytes=_VMEM_LIMIT_BYTES,
        ),
        cost_estimate=pl.CostEstimate(
            flops=3 * n,
            transcendentals=0,
            bytes_accessed=n * (a_bytes + b_bytes) + 4,
        ),
    )(a2, b2)

    total = total[0, 0]
    if reduction == "mean":
        total = total / jnp.float32(n)
    return total.astype(out_dtype)


if __name__ == "__main__":
    key = jax.random.PRNGKey(0)
    k1, k2, k3, k4 = jax.random.split(key, 4)

    # NCHW inputs, consistent with typical conv-reconstruction usage.
    x = jax.random.normal(k1, (2, 4, 16, 16), dtype=jnp.float32)  # recon_result
    y = jax.random.normal(k2, (2, 4, 16, 16), dtype=jnp.float32)  # input / target

    loss_mean = l1_loss_pallas(x, y, reduction="mean")
    loss_sum = l1_loss_pallas(x, y, reduction="sum")
    loss_none = l1_loss_pallas(x, y, reduction="none")
    jax.block_until_ready((loss_mean, loss_sum, loss_none))

    assert jnp.allclose(loss_mean, jnp.mean(jnp.abs(x - y)), rtol=1e-5, atol=1e-5)
    assert jnp.allclose(loss_sum, jnp.sum(jnp.abs(x - y)), rtol=1e-5, atol=1e-4)
    assert jnp.allclose(loss_none, jnp.abs(x - y), rtol=1e-5, atol=1e-6)

    # Exercise the partial-last-block (masked) path with a tiny forced block.
    a = jax.random.normal(k3, (8, 1280), dtype=jnp.float32)
    b = jax.random.normal(k4, (8, 1280), dtype=jnp.float32)
    m2 = l1_loss_pallas(a, b, reduction="mean", target_block_elems=4096)
    n2 = l1_loss_pallas(a, b, reduction="none", target_block_elems=4096)
    jax.block_until_ready((m2, n2))
    assert jnp.allclose(m2, jnp.mean(jnp.abs(a - b)), rtol=1e-5, atol=1e-5)
    assert jnp.allclose(n2, jnp.abs(a - b), rtol=1e-5, atol=1e-6)

    print("KERNEL_OK")
</pallas_src>

<mosaic_0001>
module attributes {stable_mosaic.version = 11 : i64} {
  func.func @_l1_reduce_kernel(%arg0: i32, %arg1: memref<4x512xf32, #tpu.memory_space<vmem>>, %arg2: memref<4x512xf32, #tpu.memory_space<vmem>>, %arg3: memref<1x1xf32, #tpu.memory_space<smem>>, %arg4: memref<4x512xf32, #tpu.memory_space<vmem>>) attributes {dimension_semantics = [#tpu.dimension_semantics<arbitrary>], iteration_bounds = array<i64: 1>, scalar_prefetch = 0 : i64, scratch_operands = 1 : i64, tpu.core_type = #tpu.core_type<tc>, window_params = [{transform_indices = @transform_0, window_bounds = array<i64: 4, 512>}, {transform_indices = @transform_1, window_bounds = array<i64: 4, 512>}, {transform_indices = @transform_2, window_bounds = array<i64: 1, 1>}]} {
    %c0_i32 = arith.constant 0 : i32
    %0 = arith.cmpi eq, %arg0, %c0_i32 : i32
    %1 = arith.extui %0 : i1 to i32
    %c0_i32_0 = arith.constant 0 : i32
    %2 = arith.cmpi ne, %1, %c0_i32_0 : i32
    scf.if %2 {
      %cst = arith.constant 0.000000e+00 : f32
      %13 = vector.broadcast %cst : f32 to vector<4x512xf32>
      %c0_10 = arith.constant 0 : index
      %c0_11 = arith.constant 0 : index
      %14 = vector.load %arg4[%c0_10, %c0_11] : memref<4x512xf32, #tpu.memory_space<vmem>>, vector<4x512xf32>
      tpu.vector_store %arg4[%c0_10, %c0_11], %13 {strides = array<i32>} : memref<4x512xf32, #tpu.memory_space<vmem>>, vector<4x512xf32>,
    } else {
    }
    %c0 = arith.constant 0 : index
    %c0_1 = arith.constant 0 : index
    %3 = vector.load %arg1[%c0, %c0_1] : memref<4x512xf32, #tpu.memory_space<vmem>>, vector<4x512xf32>
    %c0_2 = arith.constant 0 : index
    %c0_3 = arith.constant 0 : index
    %4 = vector.load %arg2[%c0_2, %c0_3] : memref<4x512xf32, #tpu.memory_space<vmem>>, vector<4x512xf32>
    %5 = arith.subf %3, %4 : vector<4x512xf32>
    %6 = math.absf %5 : vector<4x512xf32>
    %c0_4 = arith.constant 0 : index
    %c0_5 = arith.constant 0 : index
    %7 = vector.load %arg4[%c0_4, %c0_5] : memref<4x512xf32, #tpu.memory_space<vmem>>, vector<4x512xf32>
    %8 = arith.addf %7, %6 : vector<4x512xf32>
    %c0_6 = arith.constant 0 : index
    %c0_7 = arith.constant 0 : index
    %9 = vector.load %arg4[%c0_6, %c0_7] : memref<4x512xf32, #tpu.memory_space<vmem>>, vector<4x512xf32>
    tpu.vector_store %arg4[%c0_6, %c0_7], %8 {strides = array<i32>} : memref<4x512xf32, #tpu.memory_space<vmem>>, vector<4x512xf32>,
    %c0_i32_8 = arith.constant 0 : i32
    %10 = arith.cmpi eq, %arg0, %c0_i32_8 : i32
    %11 = arith.extui %10 : i1 to i32
    %c0_i32_9 = arith.constant 0 : i32
    %12 = arith.cmpi ne, %11, %c0_i32_9 : i32
    scf.if %12 {
      %c0_10 = arith.constant 0 : index
      %c0_11 = arith.constant 0 : index
      %13 = vector.load %arg4[%c0_10, %c0_11] : memref<4x512xf32, #tpu.memory_space<vmem>>, vector<4x512xf32>
      %14 = vector.shape_cast %13 : vector<4x512xf32> to vector<1x4x512xf32>
      %cst = arith.constant dense<0.000000e+00> : vector<1xf32>
      %15 = vector.multi_reduction <add>, %14, %cst [1, 2] : vector<1x4x512xf32> to vector<1xf32>
      %16 = vector.shape_cast %15 : vector<1xf32> to vector<1x1x1xf32>
      %17 = vector.extract %16[0, 0, 0] : f32 from vector<1x1x1xf32>
      %c0_12 = arith.constant 0 : index
      %c0_13 = arith.constant 0 : index
      %18 = memref.load %arg3[%c0_12, %c0_13] : memref<1x1xf32, #tpu.memory_space<smem>>
      memref.store %17, %arg3[%c0_12, %c0_13] : memref<1x1xf32, #tpu.memory_space<smem>>
    } else {
    }
    return
  }
  func.func @transform_0(%arg0: i32) -> (i32, i32) {
    %c0_i32 = arith.constant 0 : i32
    %c0_i32_0 = arith.constant 0 : i32
    return %arg0, %c0_i32 : i32, i32
  }
  func.func @transform_1(%arg0: i32) -> (i32, i32) {
    %c0_i32 = arith.constant 0 : i32
    %c0_i32_0 = arith.constant 0 : i32
    return %arg0, %c0_i32 : i32, i32
  }
  func.func @transform_2(%arg0: i32) -> (i32, i32) {
    %c0_i32 = arith.constant 0 : i32
    %c0_i32_0 = arith.constant 0 : i32
    %c0_i32_1 = arith.constant 0 : i32
    return %c0_i32, %c0_i32_0 : i32, i32
  }
}

</mosaic_0001>

<bundles_post_ra>
// kernel: tpu_custom_call.1
= control target key start
LH: loop header
LB: loop body
LE: loop exit
PB: predicated region body
PF: predicated region fallthrough
CT: control target
= control target key end

     0   :  { %7 = vsyncpa [#allocation4], 0  ;;  %s220_s0 = inlined_call_operand.hbm [shape: f32[4,512], index: 0, kind: input, shape index: {}]   ;;  %s221_s1 = inlined_call_operand.hbm [shape: f32[4,512], index: 1, kind: input, shape index: {}]   ;;  %s222_s2 = inlined_call_operand.hbm [shape: f32[1,1], index: 2, kind: output, shape index: {}]  }
   0x1   :  { %8 = vsyncpa [#allocation7], 0 }
   0x2   :  { %9 = vsyncpa [#allocation5], 0  ;;  %s166_s9 = smov [#allocation3]   ;;  %s167_s11 = smov [#allocation6]  }
   0x3   :  { %s16_s10 = sshll.u32 %s166_s9, 4  ;;  %s26_s12 = sshll.u32 %s167_s11, 4  ;;  %s17_s10 = int_to_ptr.vmem [resolvable:$true] %s16_s10  ;;  %s27_s12 = int_to_ptr.vmem [resolvable:$true] %s26_s12 }
   0x4   :  { %s106_s15 = scalar_lea.hbm %s220_s0, 256 }
   0x5   :  { %p107_p0 = scmp.ne.s32.totalorder %s220_s0, %s106_s15  ;;  %p110_p1 = scmp.lt.u32.totalorder %s106_s15, %s220_s0 }
   0x7   :  { %p112_p2 = pnand %p110_p1, %p107_p0 }
   0x9   :  { %115 = shalt.err (!%p112_p2)
}
   0xa   :  { %s116_s20 = scalar_lea.vmem %s17_s10, 256  ;;  %p121_p4 = scmp.lt.s32.totalorder %s17_s10, %s17_s10 }
   0xb   :  { %p117_p3 = scmp.ne.s32.totalorder %s17_s10, %s116_s20  ;;  %p122_p5 = scmp.lt.s32.totalorder %s116_s20, %s116_s20 }
   0xd   :  { %p123_p6 = por %p122_p5, %p121_p4 }
   0xf   :  { %p124_p7 = pnand %p123_p6, %p117_p3 }
  0x11   :  { %127 = shalt.err (!%p124_p7)
}
  0x12   :  { %19 = dma.hbm_to_vmem [thread:$0]  %s220_s0, 256, %s17_s10, [#allocation4]  }
  0x13   :  { %s128_s25 = scalar_lea.hbm %s221_s1, 256 }
  0x14   :  { %p129_p8 = scmp.ne.s32.totalorder %s221_s1, %s128_s25  ;;  %p132_p9 = scmp.lt.u32.totalorder %s128_s25, %s221_s1 }
  0x16   :  { %p134_p10 = pnand %p132_p9, %p129_p8 }
  0x18   :  { %137 = shalt.err (!%p134_p10)
}
  0x19   :  { %s138_s30 = scalar_lea.vmem %s27_s12, 256  ;;  %p143_p12 = scmp.lt.s32.totalorder %s27_s12, %s27_s12 }
  0x1a   :  { %p139_p11 = scmp.ne.s32.totalorder %s27_s12, %s138_s30  ;;  %p144_p13 = scmp.lt.s32.totalorder %s138_s30, %s138_s30 }
  0x1c   :  { %p145_p0 = por %p144_p13, %p143_p12 }
  0x1e   :  { %p146_p1 = pnand %p145_p0, %p139_p11 }
  0x20   :  { %149 = shalt.err (!%p146_p1)
}
  0x21   :  { %29 = dma.hbm_to_vmem [thread:$0]  %s221_s1, 256, %s27_s12, [#allocation7]  }
  0x22   :  { %160 = dma.done.wait [#allocation4], 256  }
  0x23   :  { %161 = vsyncadd [#allocation4], 4294967040 }
  0x24   :  { %162 = dma.done.wait [#allocation7], 256  }
  0x25   :  { %163 = vsyncadd [#allocation7], 4294967040  ;;  %v42_v0 = vld [vmem:[#allocation3] sm:$0xff]  ;;  %v43_v1 = vld [vmem:[#allocation3 + $0x8] sm:$0xff]  ;;  %vm67_vm0 = vcmask 1043456   ;;  %s150_s6 = scalar_lea.hbm %s222_s2, 16 }
  0x26   :  { %v44_v2 = vld [vmem:[#allocation6] sm:$0xff]  ;;  %v45_v3 = vld [vmem:[#allocation6 + $0x8] sm:$0xff]  ;;  %p151_p2 = scmp.ne.s32.totalorder %s222_s2, %s150_s6  ;;  %p154_p3 = scmp.lt.u32.totalorder %s150_s6, %s222_s2 }
  0x27   :  { %v46_v4 = vsub.f32 %v42_v0, %v44_v2  ;;  %v47_v5 = vsub.f32 %v43_v1, %v45_v3 }
  0x28   :  { %p156_p4 = pnand %p154_p3, %p151_p2 }
  0x29   :  { %v48_v6 = vand.u32 2147483647, %v46_v4  ;;  %v49_v7 = vand.u32 2147483647, %v47_v5 }
  0x2b   :  { %v63_v8 = vcombine.high %v48_v6, %v48_v6  ;;  %v68_v9 = vsel %vm67_vm0, %v48_v6, 0.0  ;;  %v64_v10 = vcombine.high %v49_v7, %v49_v7  ;;  %v71_v12 = vsel %vm67_vm0, %v49_v7, 0.0 }
  0x2d   :  { %v69_v11 = vsel %vm67_vm0, %v63_v8, 0.0  ;;  %v73_v14 = vsel %vm67_vm0, %v64_v10, 0.0 }
  0x2e   :  { %v70_v13 = vadd.f32 %v69_v11, %v68_v9 }
  0x30   :  { %v72_v15 = vadd.f32 %v71_v12, %v70_v13 }
  0x32   :  { %v74_v16 = vadd.f32 %v73_v14, %v72_v15 }
  0x34   :  { %75 = vadd.xlane.f32.xlu0 %v74_v16 }
  0xc1   :  { %v76_v17 = vpop.xlane.xlu0 %75 }
  0xc2   :  { %v77_v18 = vrot.slane %v76_v17, 4 }
  0xc4   :  { %v78_v19 = vadd.f32 %v77_v18, %v76_v17 }
  0xc6   :  { %v79_v20 = vrot.slane %v78_v19, 2 }
  0xc8   :  { %v80_v21 = vadd.f32 %v79_v20, %v78_v19 }
  0xca   :  { %v81_v22 = vrot.slane %v80_v21, 1 }
  0xcc   :  { %v82_v23 = vadd.f32 %v81_v22, %v80_v21 }
  0xce   :  { %101 = vpush %v82_v23 }
  0xff   :  { %s102_s1 = spop %101 }
 0x100   :  { %85 = sst [smem:[#allocation8]] %s102_s1 }
 0x101   :  { %159 = shalt.err (!%p156_p4)
}
 0x102   :  { %s168_s11 = smov [#allocation8]  }
 0x103   :  { %93 = dma.smem_to_hbm %s168_s11, 16, %s222_s2, [#allocation5]  }
 0x104   :  { %164 = dma.done.wait [#allocation5], 16  }
 0x105   :  { %165 = vsyncadd [#allocation5], 4294967280 }
 0x106   :  { %97 = sfence }
 0x107   :  { %98 = vsyncpa [#allocation4], 1 }
 0x108   :  { %99 = vsyncpa [#allocation7], 1 }
 0x109   :  { %100 = vsyncpa [#allocation5], 1 }

</bundles_post_ra>
